<compile_context>
chip_gen: v7x
topology: tpu7x:2x2x1
jax: 0.10.0
libtpu: 0.0.40
codegen_flags: <defaults>
</compile_context>

<pallas_src>
import functools

import jax
import jax.numpy as jnp
import numpy as np
from jax.experimental import pallas as pl
from jax.experimental.pallas import tpu as pltpu


# ----------------------------------------------------------------------------
# Pallas kernel: dilated conv + bias + ReLU + channel concat, one batch element
# ----------------------------------------------------------------------------
def sedrdb_conv_kernel(x_ref, w_ref, b_ref, col_ref, o_ref, xp_ref, *,
                       H, W, K, dil, Cin, G, pad, compute_dtype):
    """Refs (batch dim squeezed by the BlockSpec):
      x_ref  : (Cin, H*W)              input, channels on sublanes, spatial on lanes
      w_ref  : (K*K, G, Cin)           per-tap conv weights (tap-major)
      b_ref  : (G, 1)                  bias column
      col_ref: (1, H*W)   int32        column index (w = p % W) per lane position
      o_ref  : (Cin+G, H*W)            output = concat(x, relu(conv(x))) on sublanes
      xp_ref : (Cin, H*W + 2*margin)   flat-indexed padded copy of x (VMEM scratch)
    """
    HW = H * W
    margin = pad * (W + 1)

    xv = x_ref[...]                                                   # (Cin, HW)

    # Pass-through half of torch.cat((x, out), 1): lane-dense sublane-range store.
    o_ref[0:Cin, :] = xv.astype(o_ref.dtype)

    # Flat-index padded copy of x in VMEM. Only the two tiny border strips are
    # zeroed (the centre is fully overwritten), every step -> megacore-safe.
    xf = xv.astype(jnp.float32)
    if margin > 0:
        xp_ref[:, 0:margin] = jnp.zeros((Cin, margin), xp_ref.dtype)
        xp_ref[:, HW + margin:] = jnp.zeros((Cin, margin), xp_ref.dtype)
    xp_ref[:, margin:margin + HW] = xf

    # Horizontal-wrap validity masks, one per distinct kx offset (int VALU work).
    wpos = col_ref[...]                                               # (1, HW) int32
    valid_by_kx = []
    for kx in range(K):
        dx = kx * dil - pad
        if dx == 0:
            valid_by_kx.append(None)
        else:
            valid_by_kx.append(jnp.logical_and(wpos + dx >= 0, wpos + dx < W))

    wv = w_ref[...].astype(compute_dtype)                             # (K*K, G, Cin)

    # K*K accumulating MXU dots; taps are static lane-offset slices of the
    # flat padded scratch (no im2col concat / relayout).
    acc = jnp.zeros((G, HW), jnp.float32)
    for ky in range(K):
        for kx in range(K):
            dy = ky * dil - pad
            dx = kx * dil - pad
            s = dy * W + dx
            tap = xp_ref[:, margin + s:margin + s + HW]               # (Cin, HW) f32
            if valid_by_kx[kx] is not None:
                tap = jnp.where(valid_by_kx[kx], tap, 0.0)
            w_tap = wv[ky * K + kx]                                   # (G, Cin)
            acc = acc + jnp.dot(w_tap, tap.astype(compute_dtype),
                                preferred_element_type=jnp.float32)   # (G, HW)

    # Bias + ReLU in f32, then the second half of the concat (lane-dense store).
    acc = jnp.maximum(acc + b_ref[...].astype(jnp.float32), 0.0)
    o_ref[Cin:Cin + G, :] = acc.astype(o_ref.dtype)


# ----------------------------------------------------------------------------
# Wrapper: PyTorch NCHW in / NCHW out (reshape only, no transposes)
# ----------------------------------------------------------------------------
def sedrdb_conv_forward(x_nchw, weight, bias, *, dilate, kSize=3,
                        compute_dtype=jnp.bfloat16):
    """x_nchw: (B, Cin, H, W); weight: (G, Cin, K, K) [PyTorch layout]; bias: (G,)."""
    B, Cin, H, W = x_nchw.shape
    G = weight.shape[0]
    K = kSize
    pad = dilate * (K - 1) // 2
    HW = H * W
    margin = pad * (W + 1)
    Ct = Cin + G

    x_flat = x_nchw.reshape(B, Cin, HW)                               # free (contiguous)
    # (G, Cin, K, K) -> (K, K, G, Cin) -> (K*K, G, Cin): tap-major weight slabs.
    w_taps = jnp.transpose(weight, (2, 3, 0, 1)).reshape(K * K, G, Cin)
    b_col = bias.reshape(G, 1)
    # Column index of each lane position p (w = p % W), precomputed host-side.
    col_idx = jnp.asarray((np.arange(HW, dtype=np.int32) % W).reshape(1, HW))

    kernel = functools.partial(
        sedrdb_conv_kernel, H=H, W=W, K=K, dil=dilate, Cin=Cin, G=G,
        pad=pad, compute_dtype=compute_dtype)

    itemsize = x_nchw.dtype.itemsize
    cost = pl.CostEstimate(
        flops=2 * B * HW * K * K * Cin * G,
        transcendentals=0,
        bytes_accessed=(B * Cin * HW + B * Ct * HW) * itemsize
                       + w_taps.size * weight.dtype.itemsize
                       + bias.size * bias.dtype.itemsize
                       + HW * 4)

    out = pl.pallas_call(
        kernel,
        out_shape=jax.ShapeDtypeStruct((B, Ct, HW), x_nchw.dtype),
        grid=(B,),
        in_specs=[
            pl.BlockSpec((None, Cin, HW), lambda i: (i, 0, 0)),       # x, lane-dense
            pl.BlockSpec((K * K, G, Cin), lambda i: (0, 0, 0)),       # weights
            pl.BlockSpec((G, 1), lambda i: (0, 0)),                   # bias
            pl.BlockSpec((1, HW), lambda i: (0, 0)),                  # column index
        ],
        out_specs=pl.BlockSpec((None, Ct, HW), lambda i: (i, 0, 0)),  # concat, lane-dense
        scratch_shapes=[pltpu.VMEM((Cin, HW + 2 * margin), jnp.float32)],
        compiler_params=pltpu.CompilerParams(
            dimension_semantics=("parallel",)),
        cost_estimate=cost,
    )(x_flat, w_taps, b_col, col_idx)

    return out.reshape(B, Ct, H, W)                                   # free (contiguous)


# ----------------------------------------------------------------------------
# Pure-JAX reference (PyTorch semantics) for verification
# ----------------------------------------------------------------------------
def sedrdb_conv_ref(x_nchw, weight, bias, *, dilate):
    K = weight.shape[-1]
    pad = dilate * (K - 1) // 2
    y = jax.lax.conv_general_dilated(
        x_nchw, weight, (1, 1), [(pad, pad), (pad, pad)],
        rhs_dilation=(dilate, dilate),
        dimension_numbers=("NCHW", "OIHW", "NCHW"))
    y = jnp.maximum(y + bias.reshape(1, -1, 1, 1), 0.0)
    return jnp.concatenate([x_nchw, y], axis=1)


# ----------------------------------------------------------------------------
# Main
# ----------------------------------------------------------------------------
if __name__ == "__main__":
    # SEDRDB_Conv(inChannels=4, growRate=16, dilate=d, kSize=3) on a 16x16 image.
    B, Cin, H, W = 2, 4, 16, 16
    G, kSize = 16, 3

    key = jax.random.PRNGKey(0)
    kx_, kw_, kb_ = jax.random.split(key, 3)
    x = jax.random.normal(kx_, (B, Cin, H, W), jnp.float32)           # NCHW like PyTorch
    scale = 1.0 / np.sqrt(Cin * kSize * kSize)
    weight = jax.random.uniform(kw_, (G, Cin, kSize, kSize), jnp.float32, -scale, scale)
    bias = jax.random.uniform(kb_, (G,), jnp.float32, -scale, scale)

    for dilate in (1, 2):                                             # both padding configs
        ref = jax.block_until_ready(sedrdb_conv_ref(x, weight, bias, dilate=dilate))

        # f32 MXU operands: tight check against the XLA reference.
        out_f32 = jax.block_until_ready(
            sedrdb_conv_forward(x, weight, bias, dilate=dilate, kSize=kSize,
                                compute_dtype=jnp.float32))
        assert out_f32.shape == (B, Cin + G, H, W), out_f32.shape
        np.testing.assert_allclose(np.asarray(out_f32), np.asarray(ref),
                                   atol=1e-3, rtol=1e-3)

        # bf16 MXU operands (default fast path), f32 accumulation: looser tol.
        out_bf16 = jax.block_until_ready(
            sedrdb_conv_forward(x, weight, bias, dilate=dilate, kSize=kSize))
        assert out_bf16.shape == (B, Cin + G, H, W), out_bf16.shape
        np.testing.assert_allclose(np.asarray(out_bf16), np.asarray(ref),
                                   atol=3e-2, rtol=3e-2)

    print("KERNEL_OK")
</pallas_src>

<mosaic_0001>
module attributes {stable_mosaic.version = 11 : i64} {
  func.func @sedrdb_conv_kernel(%arg0: i32, %arg1: memref<1x4x256xf32, #tpu.memory_space<vmem>>, %arg2: memref<9x16x4xf32, #tpu.memory_space<vmem>>, %arg3: memref<16x1xf32, #tpu.memory_space<vmem>>, %arg4: memref<1x256xi32, #tpu.memory_space<vmem>>, %arg5: memref<1x20x256xf32, #tpu.memory_space<vmem>>, %arg6: memref<4x290xf32, #tpu.memory_space<vmem>>) attributes {dimension_semantics = [#tpu.dimension_semantics<parallel>], iteration_bounds = array<i64: 2>, scalar_prefetch = 0 : i64, scratch_operands = 1 : i64, tpu.core_type = #tpu.core_type<tc>, window_params = [{transform_indices = @transform_0, window_bounds = array<i64: 1, 4, 256>}, {pipeline_mode = #tpu.pipeline_mode<synchronous>, transform_indices = @transform_1, window_bounds = array<i64: 9, 16, 4>}, {pipeline_mode = #tpu.pipeline_mode<synchronous>, transform_indices = @transform_2, window_bounds = array<i64: 16, 1>}, {pipeline_mode = #tpu.pipeline_mode<synchronous>, transform_indices = @transform_3, window_bounds = array<i64: 1, 256>}, {transform_indices = @transform_4, window_bounds = array<i64: 1, 20, 256>}]} {
    %c0 = arith.constant 0 : index
    %c0_0 = arith.constant 0 : index
    %c0_1 = arith.constant 0 : index
    %0 = vector.load %arg1[%c0, %c0_0, %c0_1] : memref<1x4x256xf32, #tpu.memory_space<vmem>>, vector<1x4x256xf32>
    %1 = vector.shape_cast %0 : vector<1x4x256xf32> to vector<4x256xf32>
    %c0_2 = arith.constant 0 : index
    %c0_3 = arith.constant 0 : index
    %c0_4 = arith.constant 0 : index
    %2 = vector.load %arg5[%c0_2, %c0_3, %c0_4] : memref<1x20x256xf32, #tpu.memory_space<vmem>>, vector<1x4x256xf32>
    %3 = vector.shape_cast %2 : vector<1x4x256xf32> to vector<4x256xf32>
    %4 = vector.shape_cast %1 : vector<4x256xf32> to vector<1x4x256xf32>
    tpu.vector_store %arg5[%c0_2, %c0_3, %c0_4], %4 {strides = array<i32>} : memref<1x20x256xf32, #tpu.memory_space<vmem>>, vector<1x4x256xf32>,
    %cst = arith.constant 0.000000e+00 : f32
    %5 = vector.broadcast %cst : f32 to vector<4x17xf32>
    %c0_5 = arith.constant 0 : index
    %c0_6 = arith.constant 0 : index
    %6 = vector.load %arg6[%c0_5, %c0_6] : memref<4x290xf32, #tpu.memory_space<vmem>>, vector<4x17xf32>
    tpu.vector_store %arg6[%c0_5, %c0_6], %5 {strides = array<i32>} : memref<4x290xf32, #tpu.memory_space<vmem>>, vector<4x17xf32>,
    %cst_7 = arith.constant 0.000000e+00 : f32
    %7 = vector.broadcast %cst_7 : f32 to vector<4x17xf32>
    %c0_8 = arith.constant 0 : index
    %c273 = arith.constant 273 : index
    %8 = vector.load %arg6[%c0_8, %c273] : memref<4x290xf32, #tpu.memory_space<vmem>>, vector<4x17xf32>
    tpu.vector_store %arg6[%c0_8, %c273], %7 {strides = array<i32>} : memref<4x290xf32, #tpu.memory_space<vmem>>, vector<4x17xf32>,
    %c0_9 = arith.constant 0 : index
    %c17 = arith.constant 17 : index
    %9 = vector.load %arg6[%c0_9, %c17] : memref<4x290xf32, #tpu.memory_space<vmem>>, vector<4x256xf32>
    tpu.vector_store %arg6[%c0_9, %c17], %1 {strides = array<i32>} : memref<4x290xf32, #tpu.memory_space<vmem>>, vector<4x256xf32>,
    %c0_10 = arith.constant 0 : index
    %c0_11 = arith.constant 0 : index
    %10 = vector.load %arg4[%c0_10, %c0_11] : memref<1x256xi32, #tpu.memory_space<vmem>>, vector<1x256xi32>
    %c-1_i32 = arith.constant -1 : i32
    %11 = vector.broadcast %c-1_i32 : i32 to vector<1x256xi32>
    %12 = arith.addi %10, %11 : vector<1x256xi32>
    %c0_i32 = arith.constant 0 : i32
    %13 = vector.broadcast %c0_i32 : i32 to vector<1x256xi32>
    %14 = arith.cmpi sge, %12, %13 : vector<1x256xi32>
    %c-1_i32_12 = arith.constant -1 : i32
    %15 = vector.broadcast %c-1_i32_12 : i32 to vector<1x256xi32>
    %16 = arith.addi %10, %15 : vector<1x256xi32>
    %c16_i32 = arith.constant 16 : i32
    %17 = vector.broadcast %c16_i32 : i32 to vector<1x256xi32>
    %18 = arith.cmpi slt, %16, %17 : vector<1x256xi32>
    %19 = arith.andi %14, %18 : vector<1x256xi1>
    %c1_i32 = arith.constant 1 : i32
    %20 = vector.broadcast %c1_i32 : i32 to vector<1x256xi32>
    %21 = arith.addi %10, %20 : vector<1x256xi32>
    %c0_i32_13 = arith.constant 0 : i32
    %22 = vector.broadcast %c0_i32_13 : i32 to vector<1x256xi32>
    %23 = arith.cmpi sge, %21, %22 : vector<1x256xi32>
    %c1_i32_14 = arith.constant 1 : i32
    %24 = vector.broadcast %c1_i32_14 : i32 to vector<1x256xi32>
    %25 = arith.addi %10, %24 : vector<1x256xi32>
    %c16_i32_15 = arith.constant 16 : i32
    %26 = vector.broadcast %c16_i32_15 : i32 to vector<1x256xi32>
    %27 = arith.cmpi slt, %25, %26 : vector<1x256xi32>
    %28 = arith.andi %23, %27 : vector<1x256xi1>
    %c0_16 = arith.constant 0 : index
    %c0_17 = arith.constant 0 : index
    %c0_18 = arith.constant 0 : index
    %29 = vector.load %arg2[%c0_16, %c0_17, %c0_18] : memref<9x16x4xf32, #tpu.memory_space<vmem>>, vector<9x16x4xf32>
    %cst_19 = arith.constant 0.000000e+00 : f32
    %30 = vector.broadcast %cst_19 : f32 to vector<16x256xf32>
    %c0_20 = arith.constant 0 : index
    %c0_21 = arith.constant 0 : index
    %31 = vector.load %arg6[%c0_20, %c0_21] : memref<4x290xf32, #tpu.memory_space<vmem>>, vector<4x256xf32>
    %cst_22 = arith.constant 0.000000e+00 : f32
    %32 = vector.shape_cast %19 : vector<1x256xi1> to vector<1x256xi1>
    %33 = vector.broadcast %32 : vector<1x256xi1> to vector<4x256xi1>
    %34 = vector.broadcast %cst_22 : f32 to vector<4x256xf32>
    %35 = arith.select %33, %31, %34 : vector<4x256xi1>, vector<4x256xf32>
    %36 = vector.extract_strided_slice %29 {offsets = [0, 0, 0], sizes = [1, 16, 4], strides = [1, 1, 1]} : vector<9x16x4xf32> to vector<1x16x4xf32>
    %37 = vector.shape_cast %36 : vector<1x16x4xf32> to vector<16x4xf32>
    %cst_23 = arith.constant dense<0.000000e+00> : vector<16x256xf32>
    %38 = tpu.matmul %37, %35, %cst_23 {dimension_numbers = #tpu.dot_dimension_numbers<[1], [0], [0], [1], [0, 0, 1, 1], [], []>} : vector<16x4xf32>, vector<4x256xf32>, vector<16x256xf32> -> vector<16x256xf32>
    %39 = arith.addf %30, %38 : vector<16x256xf32>
    %c0_24 = arith.constant 0 : index
    %c1 = arith.constant 1 : index
    %40 = vector.load %arg6[%c0_24, %c1] : memref<4x290xf32, #tpu.memory_space<vmem>>, vector<4x256xf32>
    %41 = vector.extract_strided_slice %29 {offsets = [1, 0, 0], sizes = [1, 16, 4], strides = [1, 1, 1]} : vector<9x16x4xf32> to vector<1x16x4xf32>
    %42 = vector.shape_cast %41 : vector<1x16x4xf32> to vector<16x4xf32>
    %cst_25 = arith.constant dense<0.000000e+00> : vector<16x256xf32>
    %43 = tpu.matmul %42, %40, %cst_25 {dimension_numbers = #tpu.dot_dimension_numbers<[1], [0], [0], [1], [0, 0, 1, 1], [], []>} : vector<16x4xf32>, vector<4x256xf32>, vector<16x256xf32> -> vector<16x256xf32>
    %44 = arith.addf %39, %43 : vector<16x256xf32>
    %c0_26 = arith.constant 0 : index
    %c2 = arith.constant 2 : index
    %45 = vector.load %arg6[%c0_26, %c2] : memref<4x290xf32, #tpu.memory_space<vmem>>, vector<4x256xf32>
    %cst_27 = arith.constant 0.000000e+00 : f32
    %46 = vector.shape_cast %28 : vector<1x256xi1> to vector<1x256xi1>
    %47 = vector.broadcast %46 : vector<1x256xi1> to vector<4x256xi1>
    %48 = vector.broadcast %cst_27 : f32 to vector<4x256xf32>
    %49 = arith.select %47, %45, %48 : vector<4x256xi1>, vector<4x256xf32>
    %50 = vector.extract_strided_slice %29 {offsets = [2, 0, 0], sizes = [1, 16, 4], strides = [1, 1, 1]} : vector<9x16x4xf32> to vector<1x16x4xf32>
    %51 = vector.shape_cast %50 : vector<1x16x4xf32> to vector<16x4xf32>
    %cst_28 = arith.constant dense<0.000000e+00> : vector<16x256xf32>
    %52 = tpu.matmul %51, %49, %cst_28 {dimension_numbers = #tpu.dot_dimension_numbers<[1], [0], [0], [1], [0, 0, 1, 1], [], []>} : vector<16x4xf32>, vector<4x256xf32>, vector<16x256xf32> -> vector<16x256xf32>
    %53 = arith.addf %44, %52 : vector<16x256xf32>
    %c0_29 = arith.constant 0 : index
    %c16 = arith.constant 16 : index
    %54 = vector.load %arg6[%c0_29, %c16] : memref<4x290xf32, #tpu.memory_space<vmem>>, vector<4x256xf32>
    %cst_30 = arith.constant 0.000000e+00 : f32
    %55 = vector.shape_cast %19 : vector<1x256xi1> to vector<1x256xi1>
    %56 = vector.broadcast %55 : vector<1x256xi1> to vector<4x256xi1>
    %57 = vector.broadcast %cst_30 : f32 to vector<4x256xf32>
    %58 = arith.select %56, %54, %57 : vector<4x256xi1>, vector<4x256xf32>
    %59 = vector.extract_strided_slice %29 {offsets = [3, 0, 0], sizes = [1, 16, 4], strides = [1, 1, 1]} : vector<9x16x4xf32> to vector<1x16x4xf32>
    %60 = vector.shape_cast %59 : vector<1x16x4xf32> to vector<16x4xf32>
    %cst_31 = arith.constant dense<0.000000e+00> : vector<16x256xf32>
    %61 = tpu.matmul %60, %58, %cst_31 {dimension_numbers = #tpu.dot_dimension_numbers<[1], [0], [0], [1], [0, 0, 1, 1], [], []>} : vector<16x4xf32>, vector<4x256xf32>, vector<16x256xf32> -> vector<16x256xf32>
    %62 = arith.addf %53, %61 : vector<16x256xf32>
    %c0_32 = arith.constant 0 : index
    %c17_33 = arith.constant 17 : index
    %63 = vector.load %arg6[%c0_32, %c17_33] : memref<4x290xf32, #tpu.memory_space<vmem>>, vector<4x256xf32>
    %64 = vector.extract_strided_slice %29 {offsets = [4, 0, 0], sizes = [1, 16, 4], strides = [1, 1, 1]} : vector<9x16x4xf32> to vector<1x16x4xf32>
    %65 = vector.shape_cast %64 : vector<1x16x4xf32> to vector<16x4xf32>
    %cst_34 = arith.constant dense<0.000000e+00> : vector<16x256xf32>
    %66 = tpu.matmul %65, %63, %cst_34 {dimension_numbers = #tpu.dot_dimension_numbers<[1], [0], [0], [1], [0, 0, 1, 1], [], []>} : vector<16x4xf32>, vector<4x256xf32>, vector<16x256xf32> -> vector<16x256xf32>
    %67 = arith.addf %62, %66 : vector<16x256xf32>
    %c0_35 = arith.constant 0 : index
    %c18 = arith.constant 18 : index
    %68 = vector.load %arg6[%c0_35, %c18] : memref<4x290xf32, #tpu.memory_space<vmem>>, vector<4x256xf32>
    %cst_36 = arith.constant 0.000000e+00 : f32
    %69 = vector.shape_cast %28 : vector<1x256xi1> to vector<1x256xi1>
    %70 = vector.broadcast %69 : vector<1x256xi1> to vector<4x256xi1>
    %71 = vector.broadcast %cst_36 : f32 to vector<4x256xf32>
    %72 = arith.select %70, %68, %71 : vector<4x256xi1>, vector<4x256xf32>
    %73 = vector.extract_strided_slice %29 {offsets = [5, 0, 0], sizes = [1, 16, 4], strides = [1, 1, 1]} : vector<9x16x4xf32> to vector<1x16x4xf32>
    %74 = vector.shape_cast %73 : vector<1x16x4xf32> to vector<16x4xf32>
    %cst_37 = arith.constant dense<0.000000e+00> : vector<16x256xf32>
    %75 = tpu.matmul %74, %72, %cst_37 {dimension_numbers = #tpu.dot_dimension_numbers<[1], [0], [0], [1], [0, 0, 1, 1], [], []>} : vector<16x4xf32>, vector<4x256xf32>, vector<16x256xf32> -> vector<16x256xf32>
    %76 = arith.addf %67, %75 : vector<16x256xf32>
    %c0_38 = arith.constant 0 : index
    %c32 = arith.constant 32 : index
    %77 = vector.load %arg6[%c0_38, %c32] : memref<4x290xf32, #tpu.memory_space<vmem>>, vector<4x256xf32>
    %cst_39 = arith.constant 0.000000e+00 : f32
    %78 = vector.shape_cast %19 : vector<1x256xi1> to vector<1x256xi1>
    %79 = vector.broadcast %78 : vector<1x256xi1> to vector<4x256xi1>
    %80 = vector.broadcast %cst_39 : f32 to vector<4x256xf32>
    %81 = arith.select %79, %77, %80 : vector<4x256xi1>, vector<4x256xf32>
    %82 = vector.extract_strided_slice %29 {offsets = [6, 0, 0], sizes = [1, 16, 4], strides = [1, 1, 1]} : vector<9x16x4xf32> to vector<1x16x4xf32>
    %83 = vector.shape_cast %82 : vector<1x16x4xf32> to vector<16x4xf32>
    %cst_40 = arith.constant dense<0.000000e+00> : vector<16x256xf32>
    %84 = tpu.matmul %83, %81, %cst_40 {dimension_numbers = #tpu.dot_dimension_numbers<[1], [0], [0], [1], [0, 0, 1, 1], [], []>} : vector<16x4xf32>, vector<4x256xf32>, vector<16x256xf32> -> vector<16x256xf32>
    %85 = arith.addf %76, %84 : vector<16x256xf32>
    %c0_41 = arith.constant 0 : index
    %c33 = arith.constant 33 : index
    %86 = vector.load %arg6[%c0_41, %c33] : memref<4x290xf32, #tpu.memory_space<vmem>>, vector<4x256xf32>
    %87 = vector.extract_strided_slice %29 {offsets = [7, 0, 0], sizes = [1, 16, 4], strides = [1, 1, 1]} : vector<9x16x4xf32> to vector<1x16x4xf32>
    %88 = vector.shape_cast %87 : vector<1x16x4xf32> to vector<16x4xf32>
    %cst_42 = arith.constant dense<0.000000e+00> : vector<16x256xf32>
    %89 = tpu.matmul %88, %86, %cst_42 {dimension_numbers = #tpu.dot_dimension_numbers<[1], [0], [0], [1], [0, 0, 1, 1], [], []>} : vector<16x4xf32>, vector<4x256xf32>, vector<16x256xf32> -> vector<16x256xf32>
    %90 = arith.addf %85, %89 : vector<16x256xf32>
    %c0_43 = arith.constant 0 : index
    %c34 = arith.constant 34 : index
    %91 = vector.load %arg6[%c0_43, %c34] : memref<4x290xf32, #tpu.memory_space<vmem>>, vector<4x256xf32>
    %cst_44 = arith.constant 0.000000e+00 : f32
    %92 = vector.shape_cast %28 : vector<1x256xi1> to vector<1x256xi1>
    %93 = vector.broadcast %92 : vector<1x256xi1> to vector<4x256xi1>
    %94 = vector.broadcast %cst_44 : f32 to vector<4x256xf32>
    %95 = arith.select %93, %91, %94 : vector<4x256xi1>, vector<4x256xf32>
    %96 = vector.extract_strided_slice %29 {offsets = [8, 0, 0], sizes = [1, 16, 4], strides = [1, 1, 1]} : vector<9x16x4xf32> to vector<1x16x4xf32>
    %97 = vector.shape_cast %96 : vector<1x16x4xf32> to vector<16x4xf32>
    %cst_45 = arith.constant dense<0.000000e+00> : vector<16x256xf32>
    %98 = tpu.matmul %97, %95, %cst_45 {dimension_numbers = #tpu.dot_dimension_numbers<[1], [0], [0], [1], [0, 0, 1, 1], [], []>} : vector<16x4xf32>, vector<4x256xf32>, vector<16x256xf32> -> vector<16x256xf32>
    %99 = arith.addf %90, %98 : vector<16x256xf32>
    %c0_46 = arith.constant 0 : index
    %c0_47 = arith.constant 0 : index
    %100 = vector.load %arg3[%c0_46, %c0_47] : memref<16x1xf32, #tpu.memory_space<vmem>>, vector<16x1xf32>
    %101 = vector.broadcast %100 : vector<16x1xf32> to vector<16x256xf32>
    %102 = arith.addf %99, %101 : vector<16x256xf32>
    %cst_48 = arith.constant 0.000000e+00 : f32
    %103 = vector.broadcast %cst_48 : f32 to vector<16x256xf32>
    %104 = arith.maximumf %102, %103 : vector<16x256xf32>
    %c0_49 = arith.constant 0 : index
    %c4 = arith.constant 4 : index
    %c0_50 = arith.constant 0 : index
    %105 = vector.load %arg5[%c0_49, %c4, %c0_50] : memref<1x20x256xf32, #tpu.memory_space<vmem>>, vector<1x16x256xf32>
    %106 = vector.shape_cast %105 : vector<1x16x256xf32> to vector<16x256xf32>
    %107 = vector.shape_cast %104 : vector<16x256xf32> to vector<1x16x256xf32>
    tpu.vector_store %arg5[%c0_49, %c4, %c0_50], %107 {strides = array<i32>} : memref<1x20x256xf32, #tpu.memory_space<vmem>>, vector<1x16x256xf32>,
    return
  }
  func.func @transform_0(%arg0: i32) -> (i32, i32, i32) {
    %c0_i32 = arith.constant 0 : i32
    %c0_i32_0 = arith.constant 0 : i32
    %c0_i32_1 = arith.constant 0 : i32
    return %arg0, %c0_i32, %c0_i32_0 : i32, i32, i32
  }
  func.func @transform_1(%arg0: i32) -> (i32, i32, i32) {
    %c0_i32 = arith.constant 0 : i32
    %c0_i32_0 = arith.constant 0 : i32
    %c0_i32_1 = arith.constant 0 : i32
    %c0_i32_2 = arith.constant 0 : i32
    return %c0_i32, %c0_i32_0, %c0_i32_1 : i32, i32, i32
  }
  func.func @transform_2(%arg0: i32) -> (i32, i32) {
    %c0_i32 = arith.constant 0 : i32
    %c0_i32_0 = arith.constant 0 : i32
    %c0_i32_1 = arith.constant 0 : i32
    return %c0_i32, %c0_i32_0 : i32, i32
  }
  func.func @transform_3(%arg0: i32) -> (i32, i32) {
    %c0_i32 = arith.constant 0 : i32
    %c0_i32_0 = arith.constant 0 : i32
    %c0_i32_1 = arith.constant 0 : i32
    return %c0_i32, %c0_i32_0 : i32, i32
  }
  func.func @transform_4(%arg0: i32) -> (i32, i32, i32) {
    %c0_i32 = arith.constant 0 : i32
    %c0_i32_0 = arith.constant 0 : i32
    %c0_i32_1 = arith.constant 0 : i32
    return %arg0, %c0_i32, %c0_i32_0 : i32, i32, i32
  }
}

</mosaic_0001>

<bundles_post_ra>
// kernel: tpu_custom_call.1
= control target key start
LH: loop header
LB: loop body
LE: loop exit
PB: predicated region body
PF: predicated region fallthrough
CT: control target
= control target key end

     0   :  { %s1475_s15 = smov 0   ;;  %s1703_s0 = inlined_call_operand.vmem [shape: f32[2,4,256], index: 0, kind: input, shape index: {}]   ;;  %s1704_s1 = inlined_call_operand.vmem [shape: f32[9,16,4], index: 1, kind: input, shape index: {}]   ;;  %s1705_s2 = inlined_call_operand.vmem [shape: f32[16,1], index: 2, kind: input, shape index: {}]   ;;  %s1706_s3 = inlined_call_operand.vmem [shape: s32[1,256], index: 3, kind: input, shape index: {}]   ;;  %s1707_s4 = inlined_call_operand.vmem [shape: f32[2,20,256], index: 4, kind: output, shape index: {}]  }
   0x1 LB: > { %s1326_s16 = sadd.s32 4294967295, %s1437_s15   ;;  %p1330_p0 = scmp.ge.s32.totalorder %s1437_s15, 1  ;;  %s1437_s15 = sphi %s1475_s15, %s14_s15  }
   0x2   : > { %p162_p1 = scmp.lt.s32.totalorder %s1437_s15, 3 }
   0x4   : > { %p163_p2 = pnand %p1330_p0, %p162_p1 }
   0x5   : > { %p188_p3 = scmp.lt.s32.totalorder (!%p163_p2), %s1326_s16, 1  ;;  %vm204_vm0 = vcmask (!%p163_p2), 134144   ;;  %vm206_vm1 = vcmask (!%p163_p2), 273544   ;;  %v1439_v0 = vmov (!%p163_p2), 0.0   ;;  %v1440_v1 = vmov (!%p163_p2), 0   ;;  %s1441_s25 = smov (!%p163_p2), 17  }
   0x6   : > { %166 = sbr.rel (%p163_p2) target bundleno = 535 (0x217), region = 36  ;;  %205 = vst.msk [vmem:[#allocation2] sm:$0xf] (!%p163_p2), %vm204_vm0, %v1439_v0  ;;  %351 = vmatprep.mubr.f32.mxu1 (!%p163_p2), %v1439_v0  ;;  %774 = vmatprep.mubr.f32.mxu0 (!%p163_p2), %v1439_v0  ;;  %vm215_vm2 = vcmask (!%p163_p2), 1043592   ;;  %vm216_vm3 = vcmask (!%p163_p2), 1047556   ;;  %vm211_vm4 = vcmask (!%p163_p2), 138240   ;;  %v249_v21 = vlaneseq (!%p163_p2) }
   0x7   : > { %207 = vst.msk [vmem:[#allocation2 + $0x8] sm:$0xf] (!%p163_p2), %vm206_vm1, %v1439_v0  ;;  %1427 = vset.pattern.permute.xlu1 (!%p163_p2), %v1440_v1  ;;  %1428 = vset.pattern.permute.xlu0 (!%p163_p2), %v1440_v1  ;;  %vm217_vm5 = vmor (!%p163_p2), %vm216_vm3, %vm215_vm2  ;;  %s1442_s26 = smov (!%p163_p2), 111   ;;  %s1443_s27 = smov (!%p163_p2), 127   ;;  %v1229_v17 = vld [vmem:[%s1705_s2] sm:$0xff] (!%p163_p2)  ;;  %v1230_v18 = vld [vmem:[%s1705_s2 + $0x8] sm:$0xff] (!%p163_p2) }
   0x8   : > { %s1444_s28 = smov (!%p163_p2), 110   ;;  %s1445_s29 = smov (!%p163_p2), 126   ;;  %v220_v19 = vld [vmem:[%s1706_s3] sm:$0x3] (!%p163_p2)  ;;  %v250_v22 = vshrl.u32 (!%p163_p2), %v249_v21, 7  ;;  %vm272_vm12 = vcmask (!%p163_p2), 1039360  }
   0x9   : > { %s1446_s30 = smov (!%p163_p2), 96   ;;  %s1447_s5 = smov (!%p163_p2), 112   ;;  %v221_v20 = vadd.s32 (!%p163_p2), 4294967295, %v220_v19  ;;  %v225_v25 = vadd.s32 (!%p163_p2), 1, %v220_v19  ;;  %vm697_vm13 = vcmask (!%p163_p2), 908288   ;;  %vm282_vm14 = vcmask (!%p163_p2), 1043456  }
   0xa   : > { %s1448_s6 = smov (!%p163_p2), 95   ;;  %s1449_s7 = smov (!%p163_p2), 94   ;;  %v251_v26 = vsub.s32 (!%p163_p2), 0, %v250_v22  ;;  %v255_v29 = vsub.s32 (!%p163_p2), 1, %v250_v22  ;;  %v231_v42 = vld [vmem:[%s1704_s1 + $0x10] sm:$0xff] (!%p163_p2)  ;;  %v237_v44 = vld [vmem:[%s1704_s1 + $0x40] sm:$0xff] (!%p163_p2) }
   0xb   : > { %vm222_vm6 = vcmp.ge.s32.totalorder (!%p163_p2), %v221_v20, 0  ;;  %vm223_vm7 = vcmp.lt.s32.totalorder (!%p163_p2), %v221_v20, 16  ;;  %vm226_vm9 = vcmp.ge.s32.totalorder (!%p163_p2), %v225_v25, 0  ;;  %vm227_vm10 = vcmp.lt.s32.totalorder (!%p163_p2), %v225_v25, 16  ;;  %v232_v50 = vld [vmem:[%s1704_s1 + $0x18] sm:$0xff] (!%p163_p2)  ;;  %v229_v57 = vld [vmem:[%s1704_s1] sm:$0xff] (!%p163_p2) }
   0xc   : > { %vm224_vm8 = vmand (!%p163_p2), %vm222_vm6, %vm223_vm7  ;;  %vm802_vm2 = vcmask (!%p163_p2), 900096   ;;  %vm475_vm3 = vcmask (!%p163_p2), 1031168   ;;  %vm913_vm6 = vcmask (!%p163_p2), 785408   ;;  %v239_v62 = vld [vmem:[%s1704_s1 + $0x50] sm:$0xff] (!%p163_p2)  ;;  %vm586_vm7 = vcmask (!%p163_p2), 916480   ;;  %v242_v21 = vld [vmem:[%s1704_s1 + $0x68] sm:$0xff] (!%p163_p2) }
   0xd   : > { %s1709_s16 = smov (!%p188_p3, %s1326_s16), 1  ;;  %v248_v30 = vsel %vm224_vm8, 1, %v1440_v1  ;;  %vm228_vm11 = vmand %vm226_vm9, %vm227_vm10  ;;  %vm1024_vm8 = vcmask 777216   ;;  %vm1129_vm9 = vcmask 769024  }
   0xe   : > { %s1372_s17 = sshll.u32 %s1709_s16, 3  ;;  %s1407_s18 = smul.u32 48, %s1709_s16  ;;  %v1533_v31 = vrot.slane %v248_v30, %v251_v26  ;;  %v1535_v34 = vrot.slane %v248_v30, %v255_v29  ;;  %v455_v37 = vsel %vm228_vm11, 1, %v1440_v1 }
   0xf   : > { %s192_s21 = scalar_lea.vmem %s1703_s0, %s1372_s17  ;;  %v1559_v45 = vrot.slane %v455_v37, %v251_v26  ;;  %v1561_v46 = vrot.slane %v455_v37, %v255_v29  ;;  %v243_v26 = vld [vmem:[%s1704_s1 + $0x70] sm:$0xff]  ;;  %v238_v37 = vld [vmem:[%s1704_s1 + $0x48] sm:$0xff] }
  0x10   : > { %s1496_s24 = scalar_lea.vmem %s1707_s4, %s1407_s18  ;;  %v198_v2 = vld [vmem:[%s192_s21] sm:$0xff]  ;;  %vm257_vm15 = vcmp.eq.s32.totalorder %v1533_v31, 1  ;;  %vm258_vm1 = vcmp.eq.s32.totalorder %v1535_v34, 1  ;;  %v244_v31 = vld [vmem:[%s1704_s1 + $0x78] sm:$0xff] }
  0x11   : > { %208 = vrot.lane.b32.xlu0 %v198_v2, %s1441_s25  ;;  %v200_v3 = vcombine.high %v198_v2, %v198_v2  ;;  %202 = vst [vmem:[%s1496_s24] sm:$0xf] %v198_v2 }
  0x13   : > { %203 = vst [vmem:[%s1496_s24 + $0x8] sm:$0xf] %v200_v3  ;;  %v230_v3 = vld [vmem:[%s1704_s1 + $0x8] sm:$0xff] }
  0x83   : > { %v209_v4 = vpop.permute.xlu0 %208 }
  0x84   : > { %v210_v5 = vrot.slane %v209_v4, 4 }
  0x86   : > { %v212_v6 = vsel %vm211_vm4, %v210_v5, %v209_v4  ;;  %219 = vst.msk [vmem:[#allocation2 + $0x8] sm:$0xf] %vm204_vm0, %v210_v5  ;;  %vm275_vm0 = vcmask 31744   ;;  %vm464_vm4 = vcmp.eq.s32.totalorder %v1559_v45, 1  ;;  %v240_v5 = vld [vmem:[%s1704_s1 + $0x58] sm:$0xff] }
  0x87   : > { %218 = vst.msk [vmem:[#allocation2] sm:$0xff] %vm217_vm5, %v212_v6  ;;  %vm465_vm5 = vcmp.eq.s32.totalorder %v1561_v46, 1 }
  0x8d   : > { %v687_v7 = vld [vmem:[#allocation2 + $0x8] sm:$0xf] }
  0x8e   : > { %v264_v8 = vld [vmem:[#allocation2 + $0x8] sm:$0xf]  ;;  %695 = vrot.lane.b32.xlu0 %v687_v7, %s1442_s26  ;;  %v1501_v10 = vld [vmem:[#allocation2] sm:$0xff] }
  0x8f   : > { %270 = vrot.lane.b32.xlu1 %v264_v8, %s1443_s27  ;;  %v792_v9 = vld [vmem:[#allocation2 + $0x8] sm:$0xf]  ;;  %v1508_v11 = vcombine.high %v1501_v10, %v1501_v10  ;;  %v262_v47 = vsel %vm257_vm15, %v1501_v10, 0.0 }
  0x90   : > { %v454_v12 = vld [vmem:[#allocation2 + $0x8] sm:$0xf] }
  0x91   : > { %v903_v13 = vld [vmem:[#allocation2 + $0x8] sm:$0xf]  ;;  %v263_v43 = vsel %vm258_vm1, %v1508_v11, 0.0 }
  0x92   : > { %800 = vrot.lane.b32.xlu0 %v792_v9, %s1444_s28  ;;  %v576_v14 = vld [vmem:[#allocation2 + $0x8] sm:$0xf]  ;;  %v233_v9 = vld [vmem:[%s1704_s1 + $0x20] sm:$0xff] }
  0x93   : > { %266 = vrot.lane.b32.xlu1 %v1501_v10, %s1443_s27  ;;  %v1014_v15 = vld [vmem:[#allocation2 + $0x8] sm:$0xf] }
  0x94   : > { %v1119_v16 = vld [vmem:[#allocation2 + $0x8] sm:$0xf] }
  0x96   : > { %691 = vrot.lane.b32.xlu0 %v1501_v10, %s1442_s26 }
  0x97   : > { %796 = vrot.lane.b32.xlu1 %v1501_v10, %s1444_s28 }
  0x9a   : > { %268 = vrot.lane.b32.xlu0 %v1508_v11, %s1443_s27 }
  0x9b   : > { %693 = vrot.lane.b32.xlu1 %v1508_v11, %s1442_s26 }
  0x9e   : > { %469 = vrot.lane.b32.xlu0 %v1501_v10, %s1445_s29 }
  0x9f   : > { %473 = vrot.lane.b32.xlu1 %v454_v12, %s1445_s29 }
  0xa2   : > { %471 = vrot.lane.b32.xlu0 %v1508_v11, %s1445_s29 }
  0xa3   : > { %798 = vrot.lane.b32.xlu1 %v1508_v11, %s1444_s28 }
  0xa6   : > { %909 = vrot.lane.b32.xlu0 %v1508_v11, %s1446_s30 }
  0xa7   : > { %911 = vrot.lane.b32.xlu1 %v903_v13, %s1446_s30 }
  0xaa   : > { %580 = vrot.lane.b32.xlu0 %v1501_v10, %s1447_s5 }
  0xab   : > { %907 = vrot.lane.b32.xlu1 %v1501_v10, %s1446_s30 }
  0xae   : > { %582 = vrot.lane.b32.xlu0 %v1508_v11, %s1447_s5 }
  0xaf   : > { %584 = vrot.lane.b32.xlu1 %v576_v14, %s1447_s5 }
  0xb2   : > { %1022 = vrot.lane.b32.xlu0 %v1014_v15, %s1448_s6 }
  0xb3   : > { %1020 = vrot.lane.b32.xlu1 %v1508_v11, %s1448_s6 }
  0xb6   : > { %1125 = vrot.lane.b32.xlu0 %v1508_v11, %s1449_s7  ;;  %v241_v11 = vld [vmem:[%s1704_s1 + $0x60] sm:$0xff] }
  0xb7   : > { %1018 = vrot.lane.b32.xlu1 %v1501_v10, %s1448_s6 }
  0xba   : > { %1123 = vrot.lane.b32.xlu0 %v1501_v10, %s1449_s7 }
  0xbb   : > { %1127 = vrot.lane.b32.xlu1 %v1119_v16, %s1449_s7  ;;  %v234_v16 = vld [vmem:[%s1704_s1 + $0x28] sm:$0xff] }
  0xbe   : > { %1238 = vperm.xlu0 %1428, %v1230_v18  }
  0xbf   : > { %1233 = vperm.xlu1 %1427, %v1229_v17  }
 0x100   : > { %v696_v23 = vpop.permute.xlu0 %695 }
 0x101   : > { %v271_v24 = vpop.permute.xlu1 %270 }
 0x104   : > { %v801_v27 = vpop.permute.xlu0 %800 }
 0x105   : > { %v267_v28 = vpop.permute.xlu1 %266 }
 0x108   : > { %v692_v32 = vpop.permute.xlu0 %691 }
 0x109   : > { %v797_v33 = vpop.permute.xlu1 %796 }
 0x10c   : > { %v269_v36 = vpop.permute.xlu0 %268 }
 0x10d   : > { %v694_v35 = vpop.permute.xlu1 %693  ;;  %v274_v38 = vsel %vm272_vm12, %v269_v36, %v271_v24  ;;  %v273_v40 = vsel %vm272_vm12, %v267_v28, %v269_v36  ;;  %v236_v28 = vld [vmem:[%s1704_s1 + $0x38] sm:$0xff]  ;;  %v245_v36 = vld [vmem:[%s1704_s1 + $0x80] sm:$0xff] }
 0x10e   : > { %v1540_v39 = vsel %vm697_vm13, %v694_v35, %v696_v23  ;;  %v1542_v41 = vsel %vm697_vm13, %v692_v32, %v694_v35  ;;  %1334 = vmatprep.subr.msk.mxu1 %vm282_vm14, %v274_v38  ;;  %v235_v23 = vld [vmem:[%s1704_s1 + $0x30] sm:$0xff]  ;;  %v246_v38 = vld [vmem:[%s1704_s1 + $0x88] sm:$0xff] }
 0x10f   : > { %1350 = vmatprep.subr.msk.mxu0 %vm282_vm14, %v1540_v39  ;;  %1335 = vmatpush1.msk.msra.mxu1 %vm282_vm14, %v273_v40 }
 0x110   : > { %1351 = vmatpush1.msk.msra.mxu0 %vm282_vm14, %v1542_v41  ;;  %1336 = vmatmul.mubr.msk.f32.vlgmr.msra.gmra.mrb[0].mxu1 %vm275_vm0, %v231_v42  ;;  %v470_v49 = vpop.permute.xlu0 %469 }
 0x111   : > { %v474_v48 = vpop.permute.xlu1 %473  ;;  %1338 = vmatprep.subr.msk.mxu1 %vm282_vm14, %v263_v43  ;;  %357 = vmatprep.mubr.f32.mxu1 %v1439_v0 }
 0x112   : > { %1339 = vmatpush1.msk.msra.mxu1 %vm282_vm14, %v262_v47  ;;  %1352 = vmatmul.mubr.msk.f32.vlgmr.msra.gmra.mrb[0].mxu0 %vm275_vm0, %v237_v44 }
 0x113   : > { %885 = vmatprep.mubr.f32.mxu0 %v1439_v0 }
 0x114   : > { %1337 = vmatmul.mubr.msk.f32.gmra.mrb[2].mxu1 %vm275_vm0, %v232_v50  ;;  %v472_v52 = vpop.permute.xlu0 %471 }
 0x115   : > { %v799_v51 = vpop.permute.xlu1 %798  ;;  %v476_v55 = vsel %vm475_vm3, %v470_v49, %v472_v52  ;;  %v477_v56 = vsel %vm475_vm3, %v472_v52, %v474_v48  ;;  %440 = vmatprep.mubr.f32.mxu1 %v1439_v0 }
 0x116   : > { %v803_v53 = vsel %vm802_vm2, %v797_v33, %v799_v51  ;;  %v804_v54 = vsel %vm802_vm2, %v799_v51, %v801_v27  ;;  %v480_v60 = vsel %vm464_vm4, %v476_v55, 0.0  ;;  %v481_v61 = vsel %vm465_vm5, %v477_v56, 0.0 }
 0x117   : > { %v807_v58 = vsel %vm464_vm4, %v803_v53, 0.0  ;;  %v808_v59 = vsel %vm465_vm5, %v804_v54, 0.0  ;;  %1342 = vmatprep.subr.msk.mxu1 %vm282_vm14, %v481_v61 }
 0x118   : > { %1354 = vmatprep.subr.msk.mxu0 %vm282_vm14, %v808_v59  ;;  %v910_v1 = vpop.permute.xlu0 %909  ;;  %1340 = vmatmul.mubr.msk.f32.vlgmr.msra.gmra.mrb[0].mxu1 %vm275_vm0, %v229_v57 }
 0x119   : > { %1355 = vmatpush1.msk.msra.mxu0 %vm282_vm14, %v807_v58  ;;  %v912_v63 = vpop.permute.xlu1 %911  ;;  %1343 = vmatpush1.msk.msra.mxu1 %vm282_vm14, %v480_v60 }
 0x11a   : > { %v915_v2 = vsel %vm913_vm6, %v910_v1, %v912_v63  ;;  %446 = vmatprep.mubr.f32.mxu1 %v1439_v0  ;;  %1356 = vmatmul.mubr.msk.f32.vlgmr.msra.gmra.mrb[0].mxu0 %vm275_vm0, %v239_v62 }
 0x11b   : > { %v919_v4 = vsel %vm258_vm1, %v915_v2, 0.0  ;;  %891 = vmatprep.mubr.f32.mxu0 %v1439_v0 }
 0x11c   : > { %1358 = vmatprep.subr.msk.mxu0 %vm282_vm14, %v919_v4  ;;  %v581_v7 = vpop.permute.xlu0 %580  ;;  %1341 = vmatmul.mubr.msk.f32.gmra.mrb[2].mxu1 %vm275_vm0, %v230_v3 }
 0x11d   : > { %v908_v6 = vpop.permute.xlu1 %907  ;;  %558 = vmatprep.mubr.f32.mxu1 %v1439_v0 }
 0x11e   : > { %v914_v8 = vsel %vm913_vm6, %v908_v6, %v910_v1  ;;  %1357 = vmatmul.mubr.msk.f32.gmra.mrb[2].mxu0 %vm275_vm0, %v240_v5 }
 0x11f   : > { %v918_v10 = vsel %vm257_vm15, %v914_v8, 0.0  ;;  %996 = vmatprep.mubr.f32.mxu0 %v1439_v0 }
 0x120   : > { %1359 = vmatpush1.msk.msra.mxu0 %vm282_vm14, %v918_v10  ;;  %v583_v13 = vpop.permute.xlu0 %582  ;;  %1344 = vmatmul.mubr.msk.f32.vlgmr.msra.gmra.mrb[0].mxu1 %vm275_vm0, %v233_v9 }
 0x121   : > { %v585_v12 = vpop.permute.xlu1 %584  ;;  %v587_v14 = vsel %vm586_vm7, %v581_v7, %v583_v13  ;;  %564 = vmatprep.mubr.f32.mxu1 %v1439_v0 }
 0x122   : > { %v588_v15 = vsel %vm586_vm7, %v583_v13, %v585_v12  ;;  %v591_v17 = vsel %vm257_vm15, %v587_v14, 0.0  ;;  %1360 = vmatmul.mubr.msk.f32.vlgmr.msra.gmra.mrb[0].mxu0 %vm275_vm0, %v241_v11 }
 0x123   : > { %v592_v18 = vsel %vm258_vm1, %v588_v15, 0.0  ;;  %1002 = vmatprep.mubr.f32.mxu0 %v1439_v0 }
 0x124   : > { %1346 = vmatprep.subr.msk.mxu1 %vm282_vm14, %v592_v18  ;;  %v1023_v20 = vpop.permute.xlu0 %1022  ;;  %1345 = vmatmul.mubr.msk.f32.gmra.mrb[2].mxu1 %vm275_vm0, %v234_v16 }
 0x125   : > { %v1021_v19 = vpop.permute.xlu1 %1020  ;;  %1347 = vmatpush1.msk.msra.mxu1 %vm282_vm14, %v591_v17  ;;  %669 = vmatprep.mubr.f32.mxu1 %v1439_v0 }
 0x126   : > { %v1026_v22 = vsel %vm1024_vm8, %v1021_v19, %v1023_v20  ;;  %1373 = vmatprep.subr.msk.mxu1 %vm282_vm14, %v1540_v39  ;;  %1361 = vmatmul.mubr.msk.f32.gmra.mrb[2].mxu0 %vm275_vm0, %v242_v21 }
 0x127   : > { %1362 = vmatprep.subr.msk.mxu0 %vm282_vm14, %v1026_v22  ;;  %1101 = vmatprep.mubr.f32.mxu0 %v1439_v0 }
 0x128   : > { %v1126_v25 = vpop.permute.xlu0 %1125  ;;  %1348 = vmatmul.mubr.msk.f32.vlgmr.msra.gmra.mrb[0].mxu1 %vm275_vm0, %v235_v23 }
 0x129   : > { %v1019_v24 = vpop.permute.xlu1 %1018  ;;  %1374 = vmatpush1.msk.msra.mxu1 %vm282_vm14, %v1542_v41  ;;  %675 = vmatprep.mubr.f32.mxu1 %v1439_v0 }
 0x12a   : > { %v1025_v27 = vsel %vm1024_vm8, %v1019_v24, %v1021_v19 }
 0x12b   : > { %1363 = vmatpush1.msk.msra.mxu0 %vm282_vm14, %v1025_v27 }
 0x12c   : > { %1364 = vmatmul.mubr.msk.f32.vlgmr.msra.gmra.mrb[0].mxu0 %vm275_vm0, %v243_v26  ;;  %v1124_v30 = vpop.permute.xlu0 %1123  ;;  %1349 = vmatmul.mubr.msk.f32.gmra.mrb[2].mxu1 %vm275_vm0, %v236_v28 }
 0x12d   : > { %v1128_v29 = vpop.permute.xlu1 %1127  ;;  %1107 = vmatprep.mubr.f32.mxu0 %v1439_v0  ;;  %v1130_v33 = vsel %vm1129_vm9, %v1124_v30, %v1126_v25  ;;  %780 = vmatprep.mubr.f32.mxu1 %v1439_v0 }
 0x12e   : > { %v1131_v32 = vsel %vm1129_vm9, %v1126_v25, %v1128_v29  ;;  %v1134_v35 = vsel %vm464_vm4, %v1130_v33, 0.0 }
 0x12f   : > { %v1135_v34 = vsel %vm465_vm5, %v1131_v32, 0.0 }
 0x130   : > { %1365 = vmatmul.mubr.msk.f32.gmra.mrb[2].mxu0 %vm275_vm0, %v244_v31  ;;  %1366 = vmatprep.subr.msk.mxu0 %vm282_vm14, %v1135_v34 }
 0x131   : > { %1367 = vmatpush1.msk.msra.mxu0 %vm282_vm14, %v1134_v35  ;;  %1212 = vmatprep.mubr.f32.mxu0 %v1439_v0 }
 0x134   : > { %1368 = vmatmul.mubr.msk.f32.vlgmr.msra.gmra.mrb[0].mxu0 %vm275_vm0, %v245_v36  ;;  %1353 = vmatmul.mubr.msk.f32.vlgmr.msra.gmra.mrb[2].mxu1 %vm275_vm0, %v238_v37 }
 0x135   : > { %1218 = vmatprep.mubr.f32.mxu0 %v1439_v0 }
 0x138   : > { %1369 = vmatmul.mubr.msk.f32.gmra.mrb[2].mxu0 %vm275_vm0, %v246_v38 }
 0x13d   : > { %v1239_v50 = vpop.permute.xlu0 %1238 }
 0x13e   : > { %v1234_v42 = vpop.permute.xlu1 %1233 }
 0x1fb   : > { %v671_v39 = vpop.f32.mrb[0].mxu1 }
 0x1fc   : > { %v673_v40 = vpop.f32.mrb[1].mxu1 }
 0x207   : > { %v1214_v41 = vpop.f32.mrb[0].mxu0  ;;  %v782_v44 = vpop.f32.mrb[2].mxu1 }
 0x208   : > { %v1375_v43 = vadd.f32 %v1214_v41, %v671_v39  ;;  %v1216_v45 = vpop.f32.mrb[1].mxu0  ;;  %v784_v47 = vpop.f32.mrb[3].mxu1 }
 0x209   : > { %v1376_v46 = vadd.f32 %v1216_v45, %v673_v40 }
 0x20a   : > { %v1241_v48 = vadd.f32 %v1375_v43, %v1234_v42 }
 0x20b   : > { %v1242_v49 = vadd.f32 %v1376_v46, %v1234_v42  ;;  %v1220_v0 = vpop.f32.mrb[2].mxu0 }
 0x20c   : > { %v1245_v51 = vmax.f32 %v1241_v48, 0.0  ;;  %v1377_v52 = vadd.f32 %v1220_v0, %v782_v44  ;;  %v1222_v53 = vpop.f32.mrb[3].mxu0 }
 0x20d   : > { %v1246_v54 = vmax.f32 %v1242_v49, 0.0  ;;  %v1378_v55 = vadd.f32 %v1222_v53, %v784_v47 }
 0x20e   : > { %v1253_v56 = vrot.slane %v1245_v51, 4  ;;  %v1243_v57 = vadd.f32 %v1377_v52, %v1239_v50 }
 0x20f   : > { %v1254_v58 = vrot.slane %v1246_v54, 4  ;;  %v1244_v59 = vadd.f32 %v1378_v55, %v1239_v50 }
 0x210   : > { %1265 = vst [vmem:[%s1496_s24] sm:$0xf0] %v1253_v56  ;;  %v1247_v60 = vmax.f32 %v1243_v57, 0.0 }
 0x211   : > { %1266 = vst [vmem:[%s1496_s24 + $0x8] sm:$0xf0] %v1254_v58  ;;  %v1248_v61 = vmax.f32 %v1244_v59, 0.0 }
 0x212   : > { %v1255_v62 = vrot.slane %v1247_v60, 4 }
 0x213   : > { %v1257_v63 = vrot.slane %v1248_v61, 4 }
 0x214   : > { %v1256_v1 = vsel %vm282_vm14, %v1253_v56, %v1255_v62  ;;  %1269 = vst [vmem:[%s1496_s24 + $0x20] sm:$0xf] %v1255_v62 }
 0x215   : > { %v1258_v2 = vsel %vm282_vm14, %v1254_v58, %v1257_v63  ;;  %1267 = vst [vmem:[%s1496_s24 + $0x10] sm:$0xff] %v1256_v1  ;;  %1270 = vst [vmem:[%s1496_s24 + $0x28] sm:$0xf] %v1257_v63 }
 0x216   : > { %1268 = vst [vmem:[%s1496_s24 + $0x18] sm:$0xff] %v1258_v2 }
 0x217 PF: > { %s14_s15 = sadd.s32 1, %s1437_s15  }
 0x218   : > { %p11_p4 = scmp.ge.s32.totalorder %s14_s15, 4  }
 0x21a   :  { %13 = sbr.rel (!%p11_p4) target bundleno = 1 (0x1), region = 66 }

</bundles_post_ra>
